<compile_context>
chip_gen: v7x
topology: tpu7x:2x2x1
jax: 0.10.0
libtpu: 0.0.40
codegen_flags: <defaults>
</compile_context>

<pallas_src>
import functools

import jax
import jax.numpy as jnp
from jax import lax
from jax.experimental import pallas as pl
from jax.experimental.pallas import tpu as pltpu


def _vmem_config():
    """Generation-aware VMEM budgets (input budget, scoped limit, max tile rows)."""
    try:
        vmem_bytes = int(pltpu.get_tpu_info().vmem_capacity_bytes)
    except Exception:  # query unavailable (e.g. interpret mode) -> conservative
        vmem_bytes = 64 * 1024 * 1024
    input_budget = vmem_bytes // 2                       # double-buffered inputs
    vmem_limit = min((vmem_bytes * 3) // 4, 100 * 1024 * 1024)
    max_rows = 4096 if vmem_bytes >= 100 * 1024 * 1024 else 1024
    return input_budget, vmem_limit, max_rows


def _round_up_8(x):
    return -(-x // 8) * 8


def _choose_tile_b(batch, dim, dtype, input_budget, max_rows):
    """Largest multiple-of-8 row tile keeping double-buffered inputs in budget."""
    itemsize = jnp.dtype(dtype).itemsize
    per_row_bytes = 3 * 2 * dim * itemsize               # 3 inputs, 2 pipeline bufs
    t = input_budget // max(per_row_bytes, 1)
    t = max(8, (min(int(t), max_rows) // 8) * 8)
    t = min(t, _round_up_8(batch))
    # Prefer >= 2 grid blocks so both TensorCores on megacore parts (v7x) can
    # stream HBM concurrently; negligible cost (one extra step) elsewhere.
    if batch > 8:
        t = min(t, _round_up_8(-(-batch // 2)))
    return t


def _triplet_kernel(a_ref, p_ref, n_ref, out_ref, *, margin, metric, batch, tile_b):
    a = a_ref[...].astype(jnp.float32)
    p = p_ref[...].astype(jnp.float32)
    n = n_ref[...].astype(jnp.float32)

    if metric == "l2":
        eps = jnp.float32(1e-6)  # torch pairwise_distance default eps
        dp = jnp.sqrt(jnp.sum((a - p + eps) ** 2, axis=-1, keepdims=True))
        dn = jnp.sqrt(jnp.sum((a - n + eps) ** 2, axis=-1, keepdims=True))
    elif metric == "cos":
        eps = jnp.float32(1e-8)  # torch cosine_similarity default eps
        aa = jnp.sum(a * a, axis=-1, keepdims=True)
        pp = jnp.sum(p * p, axis=-1, keepdims=True)
        nn_ = jnp.sum(n * n, axis=-1, keepdims=True)
        ap = jnp.sum(a * p, axis=-1, keepdims=True)
        an = jnp.sum(a * n, axis=-1, keepdims=True)
        # max(||a||*||x||, eps) == sqrt(max(aa*xx, eps^2)); rsqrt runs on the EUP.
        dp = 1.0 - ap * lax.rsqrt(jnp.maximum(aa * pp, eps * eps))
        dn = 1.0 - an * lax.rsqrt(jnp.maximum(aa * nn_, eps * eps))
    else:
        raise ValueError("Error Loss Metric!!")

    per_row = jnp.maximum(dp - dn + jnp.float32(margin), 0.0)      # (tile_b, 1)

    # Mask rows beyond the true batch size (ragged last block reads garbage).
    row_ids = (lax.broadcasted_iota(jnp.int32, per_row.shape, 0)
               + pl.program_id(0) * tile_b)
    per_row = jnp.where(row_ids < batch, per_row, jnp.float32(0.0))

    # One masked partial sum per block; the mean is finished in the wrapper.
    out_ref[...] = jnp.sum(per_row, axis=0, keepdims=True)[None]    # (1, 1, 1)


def triplet_loss(anchor, positive, negative, *, margin=1.0, metric="l2"):
    assert anchor.ndim == 2 and anchor.shape == positive.shape == negative.shape
    if metric not in ("l2", "cos"):
        raise ValueError("Error Loss Metric!!")

    B, D = anchor.shape
    input_budget, vmem_limit, max_rows = _vmem_config()
    tile_b = _choose_tile_b(B, D, anchor.dtype, input_budget, max_rows)
    num_blocks = -(-B // tile_b)

    kernel = functools.partial(
        _triplet_kernel, margin=margin, metric=metric, batch=B, tile_b=tile_b)
    row_spec = pl.BlockSpec((tile_b, D), lambda i: (i, 0))

    itemsize = jnp.dtype(anchor.dtype).itemsize
    flops_per_elem = 8 if metric == "l2" else 10
    cost = pl.CostEstimate(
        flops=int(flops_per_elem * B * D),
        transcendentals=int(2 * B),
        bytes_accessed=int(3 * B * D * itemsize + num_blocks * 4),
    )

    partial_sums = pl.pallas_call(
        kernel,
        out_shape=jax.ShapeDtypeStruct((num_blocks, 1, 1), jnp.float32),
        grid_spec=pltpu.PrefetchScalarGridSpec(
            num_scalar_prefetch=0,
            grid=(num_blocks,),
            in_specs=[row_spec, row_spec, row_spec],
            out_specs=pl.BlockSpec((1, 1, 1), lambda i: (i, 0, 0)),
        ),
        compiler_params=pltpu.CompilerParams(
            dimension_semantics=("parallel",),   # no carried state -> megacore-friendly
            vmem_limit_bytes=int(vmem_limit),
        ),
        cost_estimate=cost,
    )(anchor, positive, negative)

    return jnp.sum(partial_sums) / jnp.float32(B)


def _reference(anchor, positive, negative, margin=1.0, metric="l2"):
    a = anchor.astype(jnp.float32)
    p = positive.astype(jnp.float32)
    n = negative.astype(jnp.float32)
    if metric == "l2":
        dp = jnp.sqrt(jnp.sum((a - p + 1e-6) ** 2, axis=-1))
        dn = jnp.sqrt(jnp.sum((a - n + 1e-6) ** 2, axis=-1))
    else:
        def cd(x, y):
            num = jnp.sum(x * y, -1)
            den = jnp.maximum(
                jnp.sqrt(jnp.sum(x * x, -1)) * jnp.sqrt(jnp.sum(y * y, -1)), 1e-8
            )
            return 1.0 - num / den
        dp, dn = cd(a, p), cd(a, n)
    return jnp.mean(jnp.maximum(dp - dn + margin, 0.0))


if __name__ == "__main__":
    key = jax.random.PRNGKey(0)
    k0, k1, k2 = jax.random.split(key, 3)
    B, D = 16, 32  # small 2-D embeddings, consistent with the module's asserts
    anchor = jax.random.normal(k0, (B, D), dtype=jnp.float32)
    positive = jax.random.normal(k1, (B, D), dtype=jnp.float32)
    negative = jax.random.normal(k2, (B, D), dtype=jnp.float32)

    loss_l2 = jax.block_until_ready(
        triplet_loss(anchor, positive, negative, margin=1.0, metric="l2"))
    loss_cos = jax.block_until_ready(
        triplet_loss(anchor, positive, negative, margin=1.0, metric="cos"))

    ref_l2 = _reference(anchor, positive, negative, 1.0, "l2")
    ref_cos = _reference(anchor, positive, negative, 1.0, "cos")
    assert jnp.allclose(loss_l2, ref_l2, rtol=1e-5, atol=1e-5), (loss_l2, ref_l2)
    assert jnp.allclose(loss_cos, ref_cos, rtol=1e-5, atol=1e-5), (loss_cos, ref_cos)

    # Ragged batch (not a multiple of the tile): exercises the in-kernel mask,
    # no padding copies anymore.
    B2 = 13
    a2 = jax.random.normal(k0, (B2, D), dtype=jnp.float32)
    p2 = jax.random.normal(k1, (B2, D), dtype=jnp.float32)
    n2 = jax.random.normal(k2, (B2, D), dtype=jnp.float32)
    l2_ragged = jax.block_until_ready(
        triplet_loss(a2, p2, n2, margin=1.0, metric="l2"))
    assert jnp.allclose(
        l2_ragged, _reference(a2, p2, n2, 1.0, "l2"), rtol=1e-5, atol=1e-5)

    # bf16 inputs: native-dtype DMA, f32 math inside the kernel.
    a3 = anchor.astype(jnp.bfloat16)
    p3 = positive.astype(jnp.bfloat16)
    n3 = negative.astype(jnp.bfloat16)
    l2_bf16 = jax.block_until_ready(
        triplet_loss(a3, p3, n3, margin=1.0, metric="l2"))
    assert jnp.allclose(
        l2_bf16, _reference(a3, p3, n3, 1.0, "l2"), rtol=5e-2, atol=5e-2)

    print("KERNEL_OK")
</pallas_src>

<mosaic_0001>
module attributes {stable_mosaic.version = 11 : i64} {
  func.func @_triplet_kernel(%arg0: i32, %arg1: memref<8x32xf32, #tpu.memory_space<vmem>>, %arg2: memref<8x32xf32, #tpu.memory_space<vmem>>, %arg3: memref<8x32xf32, #tpu.memory_space<vmem>>, %arg4: memref<1x1x1xf32, #tpu.memory_space<vmem>>) attributes {dimension_semantics = [#tpu.dimension_semantics<parallel>], iteration_bounds = array<i64: 2>, scalar_prefetch = 0 : i64, scratch_operands = 0 : i64, tpu.core_type = #tpu.core_type<tc>, window_params = [{transform_indices = @transform_0, window_bounds = array<i64: 8, 32>}, {transform_indices = @transform_1, window_bounds = array<i64: 8, 32>}, {transform_indices = @transform_2, window_bounds = array<i64: 8, 32>}, {transform_indices = @transform_3, window_bounds = array<i64: 1, 1, 1>}]} {
    %c0 = arith.constant 0 : index
    %c0_0 = arith.constant 0 : index
    %0 = vector.load %arg1[%c0, %c0_0] : memref<8x32xf32, #tpu.memory_space<vmem>>, vector<8x32xf32>
    %c0_1 = arith.constant 0 : index
    %c0_2 = arith.constant 0 : index
    %1 = vector.load %arg2[%c0_1, %c0_2] : memref<8x32xf32, #tpu.memory_space<vmem>>, vector<8x32xf32>
    %c0_3 = arith.constant 0 : index
    %c0_4 = arith.constant 0 : index
    %2 = vector.load %arg3[%c0_3, %c0_4] : memref<8x32xf32, #tpu.memory_space<vmem>>, vector<8x32xf32>
    %3 = arith.subf %0, %1 : vector<8x32xf32>
    %cst = arith.constant 9.99999997E-7 : f32
    %4 = vector.broadcast %cst : f32 to vector<8x32xf32>
    %5 = arith.addf %3, %4 : vector<8x32xf32>
    %6 = arith.mulf %5, %5 : vector<8x32xf32>
    %cst_5 = arith.constant dense<0.000000e+00> : vector<8xf32>
    %7 = vector.multi_reduction <add>, %6, %cst_5 [1] : vector<8x32xf32> to vector<8xf32>
    %8 = vector.shape_cast %7 : vector<8xf32> to vector<8x1xf32>
    %9 = math.sqrt %8 : vector<8x1xf32>
    %10 = arith.subf %0, %2 : vector<8x32xf32>
    %cst_6 = arith.constant 9.99999997E-7 : f32
    %11 = vector.broadcast %cst_6 : f32 to vector<8x32xf32>
    %12 = arith.addf %10, %11 : vector<8x32xf32>
    %13 = arith.mulf %12, %12 : vector<8x32xf32>
    %cst_7 = arith.constant dense<0.000000e+00> : vector<8xf32>
    %14 = vector.multi_reduction <add>, %13, %cst_7 [1] : vector<8x32xf32> to vector<8xf32>
    %15 = vector.shape_cast %14 : vector<8xf32> to vector<8x1xf32>
    %16 = math.sqrt %15 : vector<8x1xf32>
    %17 = arith.subf %9, %16 : vector<8x1xf32>
    %cst_8 = arith.constant 1.000000e+00 : f32
    %18 = vector.broadcast %cst_8 : f32 to vector<8x1xf32>
    %19 = arith.addf %17, %18 : vector<8x1xf32>
    %cst_9 = arith.constant 0.000000e+00 : f32
    %20 = vector.broadcast %cst_9 : f32 to vector<8x1xf32>
    %21 = arith.maximumf %19, %20 : vector<8x1xf32>
    %22 = tpu.iota {dimensions = array<i32: 0>} : vector<8x1xi32>
    %c8_i32 = arith.constant 8 : i32
    %23 = arith.muli %arg0, %c8_i32 : i32
    %24 = vector.broadcast %23 : i32 to vector<8x1xi32>
    %25 = arith.addi %22, %24 : vector<8x1xi32>
    %c16_i32 = arith.constant 16 : i32
    %26 = vector.broadcast %c16_i32 : i32 to vector<8x1xi32>
    %27 = arith.cmpi slt, %25, %26 : vector<8x1xi32>
    %cst_10 = arith.constant 0.000000e+00 : f32
    %28 = vector.broadcast %cst_10 : f32 to vector<8x1xf32>
    %29 = arith.select %27, %21, %28 : vector<8x1xi1>, vector<8x1xf32>
    %cst_11 = arith.constant dense<0.000000e+00> : vector<1xf32>
    %30 = vector.multi_reduction <add>, %29, %cst_11 [0] : vector<8x1xf32> to vector<1xf32>
    %31 = vector.shape_cast %30 : vector<1xf32> to vector<1x1xf32>
    %32 = vector.shape_cast %31 : vector<1x1xf32> to vector<1x1x1xf32>
    %c0_12 = arith.constant 0 : index
    %c0_13 = arith.constant 0 : index
    %c0_14 = arith.constant 0 : index
    %33 = vector.load %arg4[%c0_12, %c0_13, %c0_14] : memref<1x1x1xf32, #tpu.memory_space<vmem>>, vector<1x1x1xf32>
    tpu.vector_store %arg4[%c0_12, %c0_13, %c0_14], %32 {strides = array<i32>} : memref<1x1x1xf32, #tpu.memory_space<vmem>>, vector<1x1x1xf32>,
    return
  }
  func.func @transform_0(%arg0: i32) -> (i32, i32) {
    %c0_i32 = arith.constant 0 : i32
    %c0_i32_0 = arith.constant 0 : i32
    return %arg0, %c0_i32 : i32, i32
  }
  func.func @transform_1(%arg0: i32) -> (i32, i32) {
    %c0_i32 = arith.constant 0 : i32
    %c0_i32_0 = arith.constant 0 : i32
    return %arg0, %c0_i32 : i32, i32
  }
  func.func @transform_2(%arg0: i32) -> (i32, i32) {
    %c0_i32 = arith.constant 0 : i32
    %c0_i32_0 = arith.constant 0 : i32
    return %arg0, %c0_i32 : i32, i32
  }
  func.func @transform_3(%arg0: i32) -> (i32, i32, i32) {
    %c0_i32 = arith.constant 0 : i32
    %c0_i32_0 = arith.constant 0 : i32
    %c0_i32_1 = arith.constant 0 : i32
    return %arg0, %c0_i32, %c0_i32_0 : i32, i32, i32
  }
}

</mosaic_0001>

<bundles_post_ra>
// kernel: tpu_custom_call.1
= control target key start
LH: loop header
LB: loop body
LE: loop exit
PB: predicated region body
PF: predicated region fallthrough
CT: control target
= control target key end

     0   :  { %8 = vsyncpa [#allocation3], 0  ;;  %s817_s0 = inlined_call_operand.hbm [shape: f32[16,32], index: 0, kind: input, shape index: {}]   ;;  %s818_s1 = inlined_call_operand.hbm [shape: f32[16,32], index: 1, kind: input, shape index: {}]   ;;  %s819_s2 = inlined_call_operand.hbm [shape: f32[16,32], index: 2, kind: input, shape index: {}]   ;;  %s820_s3 = inlined_call_operand.vmem [shape: f32[2,1,1], index: 3, kind: output, shape index: {}]  }
   0x1   :  { %10 = vsyncpa [#allocation3 + $0x1], 0 }
   0x2   :  { %11 = vsyncpa [#allocation5], 0 }
   0x3   :  { %13 = vsyncpa [#allocation5 + $0x1], 0  ;;  %s627_s12 = smov 0   ;;  %s629_s13 = smov 0  }
   0x4   :  { %s631_s14 = smov 0   ;;  %s633_s15 = smov 0  }
   0x5 LB: > { %s646_s16 = sadd.s32 4294967295, %s602_s15   ;;  %s649_s17 = sadd.s32 1, %s602_s15   ;;  %s602_s15 = sphi %s633_s15, %s835_s15   ;;  %s598_s14 = sphi %s631_s14, %s834_s14   ;;  %s594_s13 = sphi %s629_s13, %s833_s13   ;;  %s590_s12 = sphi %s627_s12, %s832_s12  }
   0x6   : > { %s23_s18 = ssub.s32 %s602_s15, %s649_s17  ;;  %s26_s19 = sadd.s32 1, %s598_s14 }
   0x7   : > { %p24_p0 = scmp.eq.s32.totalorder %s23_s18, 0  ;;  %p33_p1 = scmp.ne.s32.totalorder %s598_s14, %s594_s13 }
   0x8   : > { %p34_p2 = scmp.eq.s32.totalorder %s602_s15, 0  ;;  %p39_p3 = scmp.ne.s32.totalorder %s594_s13, %s590_s12 }
   0x9   : > { %s659_s20 = scalar_select %p24_p0, %s598_s14, %s26_s19  }
   0xa   : > { %p35_p4 = por %p34_p2, %p33_p1  ;;  %p40_p5 = scmp.eq.s32.totalorder %s646_s16, 0 }
   0xb   : > { %p437_p6 = scmp.lt.s32.totalorder %s602_s15, 2  ;;  %s141_s22 = sand.u32 1, %s598_s14  }
   0xc   : > { %p663_p7 = por %p40_p5, %p39_p3  ;;  %s670_s23 = sshll.u32 %s141_s22, 3 }
   0xd   : > { %s673_s24 = sshll.u32 %s602_s15, 7  ;;  %p675_p8 = pnand %p437_p6, %p35_p4 }
   0xe   : > { %s823_s21 = scalar_select %p663_p7, 1, 0 }
   0xf   : > { %s824_s25 = scalar_select %p675_p8, 1, 0 }
  0x10   : > { %s159_s26 = sand.u32 1, %s602_s15   ;;  %s684_s29 = scalar_lea.hbm %s818_s1, %s673_s24 }
  0x11   : > { %s163_s30 = scalar_lea.vmem [#allocation4], %s670_s23  ;;  %s691_s5 = scalar_lea.sflag [#allocation5], %s159_s26 }
  0x12   : > { %s170_s4 = sshll.u32 %s163_s30, 4  ;;  %s474_s6 = scalar_lea.hbm %s684_s29, 128  ;;  %s688_s4 = int_to_ptr.vmem [resolvable:$true] %s170_s4 }
  0x13   : > { %p475_p11 = scmp.ne.s32.totalorder %s684_s29, %s474_s6  ;;  %p697_p12 = pneg %p675_p8 }
  0x14   : > { %s479_s10 = scalar_lea.hbm %s818_s1, 256  ;;  %p480_p1 = scmp.lt.u32.totalorder %s684_s29, %s818_s1 }
  0x15   : > { %p477_p13 = pnand %p697_p12, %p475_p11  ;;  %p481_p2 = scmp.lt.u32.totalorder %s479_s10, %s474_s6 }
  0x16   : > { %p483_p4 = scmp.lt.u32.totalorder %s474_s6, %s684_s29 }
  0x17   : > { %p478_p0 = pneg %p477_p13  ;;  %p482_p3 = por %p481_p2, %p480_p1 }
  0x19   : > { %p484_p5 = por %p483_p4, %p482_p3 }
  0x1b   : > { %p485_p6 = pnand %p484_p5, %p478_p0 }
  0x1d   : > { %488 = shalt.err (!%p485_p6)
}
  0x1e   : > { %s489_s18 = scalar_lea.vmem %s688_s4, 128  ;;  %s604_s19 = smov [#allocation4]  }
  0x1f   : > { %p490_p11 = scmp.ne.s32.totalorder %s688_s4, %s489_s18  ;;  %s494_s26 = sshll.u32 %s604_s19, 4  ;;  %s495_s26 = int_to_ptr.vmem [resolvable:$false] %s494_s26 }
  0x20   : > { %s496_s27 = scalar_lea.vmem %s495_s26, 256  ;;  %p497_p10 = scmp.lt.s32.totalorder %s688_s4, %s495_s26 }
  0x21   : > { %p492_p13 = pnand %p490_p11, %p697_p12  ;;  %p498_p7 = scmp.lt.s32.totalorder %s496_s27, %s489_s18 }
  0x23   : > { %p493_p9 = pneg %p492_p13  ;;  %p499_p1 = por %p498_p7, %p497_p10 }
  0x25   : > { %p500_p2 = pnand %p499_p1, %p493_p9 }
  0x27   : > { %503 = shalt.err (!%p500_p2)
}
  0x28   : > { %433 = dma.hbm_to_vmem [thread:$0]  (!%p675_p8), %s684_s29, 128, %s688_s4, %s691_s5  }
  0x29   : > { %p826_p0 = scmp.lt.s32.totalorder %s602_s15, 3  ;;  %p827_p3 = scmp.ge.s32.totalorder %s602_s15, 1 }
  0x2a   : > { %s733_s8 = scalar_lea.hbm %s817_s0, %s673_s24  ;;  %s145_s9 = scalar_lea.vmem [#allocation2], %s670_s23 }
  0x2b   : > { %p725_p4 = pnand %p827_p3, %p826_p0  ;;  %s152_s10 = sshll.u32 %s145_s9, 4  ;;  %s736_s10 = int_to_ptr.vmem [resolvable:$true] %s152_s10 }
  0x2c   : > { %s742_s15 = scalar_lea.hbm %s819_s2, %s673_s24  ;;  %s142_s11 = scalar_lea.sflag [#allocation3], %s141_s22 }
  0x2d   : > { %s828_s28 = scalar_select %p725_p4, 1, 0 }
  0x2e   : > { %s504_s12 = scalar_lea.hbm %s733_s8, 128  ;;  %s509_s26 = scalar_lea.hbm %s817_s0, 256 }
  0x2f   : > { %p505_p7 = scmp.ne.s32.totalorder %s733_s8, %s504_s12  ;;  %p510_p5 = scmp.lt.u32.totalorder %s733_s8, %s817_s0 }
  0x30   : > { %p511_p6 = scmp.lt.u32.totalorder %s509_s26, %s504_s12  ;;  %p513_p13 = scmp.lt.u32.totalorder %s504_s12, %s733_s8 }
  0x31   : > { %p507_p9 = pnand %p505_p7, %p697_p12 }
  0x32   : > { %p512_p11 = por %p511_p6, %p510_p5 }
  0x33   : > { %p508_p10 = pneg %p507_p9 }
  0x34   : > { %p514_p1 = por %p513_p13, %p512_p11 }
  0x36   : > { %p515_p2 = pnand %p514_p1, %p508_p10 }
  0x38   : > { %518 = shalt.err (!%p515_p2)
}
  0x39   : > { %s519_s22 = scalar_lea.vmem %s736_s10, 128  ;;  %s605_s24 = smov [#allocation2]  }
  0x3a   : > { %p520_p0 = scmp.ne.s32.totalorder %s736_s10, %s519_s22  ;;  %s524_s6 = sshll.u32 %s605_s24, 4  ;;  %s525_s6 = int_to_ptr.vmem [resolvable:$false] %s524_s6 }
  0x3b   : > { %s526_s9 = scalar_lea.vmem %s525_s6, 256  ;;  %p527_p9 = scmp.lt.s32.totalorder %s736_s10, %s525_s6 }
  0x3c   : > { %p522_p3 = pnand %p520_p0, %p697_p12  ;;  %p528_p4 = scmp.lt.s32.totalorder %s526_s9, %s519_s22 }
  0x3e   : > { %p523_p7 = pneg %p522_p3  ;;  %p529_p5 = por %p528_p4, %p527_p9 }
  0x40   : > { %p530_p6 = pnand %p529_p5, %p523_p7 }
  0x42   : > { %533 = shalt.err (!%p530_p6)
}
  0x43   : > { %430 = dma.hbm_to_vmem [thread:$0]  (!%p675_p8), %s733_s8, 128, %s736_s10, %s142_s11  }
  0x44   : > { %s181_s29 = scalar_lea.vmem [#allocation6], %s670_s23  ;;  %s534_s12 = scalar_lea.hbm %s742_s15, 128 }
  0x45   : > { %s188_s4 = sshll.u32 %s181_s29, 4  ;;  %p535_p10 = scmp.ne.s32.totalorder %s742_s15, %s534_s12  ;;  %s189_s4 = int_to_ptr.vmem [resolvable:$true] %s188_s4 }
  0x46   : > { %s539_s26 = scalar_lea.hbm %s819_s2, 256  ;;  %p540_p13 = scmp.lt.u32.totalorder %s742_s15, %s819_s2 }
  0x47   : > { %p537_p4 = pnand %p535_p10, %p697_p12  ;;  %p541_p1 = scmp.lt.u32.totalorder %s539_s26, %s534_s12 }
  0x48   : > { %p543_p0 = scmp.lt.u32.totalorder %s534_s12, %s742_s15 }
  0x49   : > { %p538_p11 = pneg %p537_p4  ;;  %p542_p2 = por %p541_p1, %p540_p13 }
  0x4b   : > { %p544_p3 = por %p543_p0, %p542_p2 }
  0x4d   : > { %p545_p7 = pnand %p544_p3, %p538_p11 }
  0x4f   : > { %548 = shalt.err (!%p545_p7)
}
  0x50   : > { %s549_s23 = scalar_lea.vmem %s189_s4, 128  ;;  %s606_s8 = smov [#allocation6]  }
  0x51   : > { %p550_p9 = scmp.ne.s32.totalorder %s189_s4, %s549_s23  ;;  %s554_s10 = sshll.u32 %s606_s8, 4  ;;  %s555_s10 = int_to_ptr.vmem [resolvable:$false] %s554_s10 }
  0x52   : > { %s556_s11 = scalar_lea.vmem %s555_s10, 256  ;;  %p557_p10 = scmp.lt.s32.totalorder %s189_s4, %s555_s10 }
  0x53   : > { %p552_p5 = pnand %p550_p9, %p697_p12  ;;  %p558_p4 = scmp.lt.s32.totalorder %s556_s11, %s549_s23 }
  0x55   : > { %p553_p6 = pneg %p552_p5  ;;  %p559_p8 = por %p558_p4, %p557_p10 }
  0x57   : > { %p560_p1 = pnand %p559_p8, %p553_p6 }
  0x59   : > { %563 = shalt.err (!%p560_p1)
}
  0x5a   : > { %p829_p13 = scmp.ne.s32.totalorder %s824_s25, 0  ;;  %p830_p11 = scmp.ne.s32.totalorder %s828_s28, 0 }
  0x5b   : > { %s199_s7 = sand.u32 (!%p830_p11), 1, %s594_s13   ;;  %p831_p12 = scmp.ne.s32.totalorder (!%p830_p11), %s823_s21, 0 }
  0x5c   : > { %436 = dma.hbm_to_vmem [thread:$0]  (!%p829_p13), %s742_s15, 128, %s189_s4, %s691_s5  }
  0x5d   : > { %197 = sbr.rel (%p830_p11) target bundleno = 293 (0x125), region = 32  ;;  %s415_s22 = sshll.u32 (!%p830_p11), %s199_s7, 3 }
  0x5e   : > { %s200_s24 = scalar_lea.sflag (!%p830_p11), [#allocation3], %s199_s7  ;;  %s203_s6 = scalar_lea.vmem (!%p830_p11), [#allocation2], %s415_s22 }
  0x64   : > { %581 = dma.done.wait (%p831_p12), %s200_s24, 128  }
  0x65   : > { %583 = vsyncadd (%p831_p12), %s200_s24, 4294967168  ;;  %s208_s25 = sand.u32 1, %s646_s16   ;;  %s212_s29 = scalar_lea.vmem [#allocation4], %s415_s22 }
  0x66   : > { %s209_s9 = scalar_lea.sflag [#allocation5], %s208_s25 }
  0x67   : > { %585 = dma.done.wait (%p831_p12), %s209_s9, 256  }
  0x68   : > { %587 = vsyncadd (%p831_p12), %s209_s9, 4294967040  ;;  %v255_v0 = vld [vmem:[%s203_s6] sm:$0xff]  ;;  %v256_v1 = vld [vmem:[%s212_s29] sm:$0xff]  ;;  %s221_s5 = scalar_lea.vmem [#allocation6], %s415_s22  ;;  %vm261_vm0 = vcmask 261120   ;;  %v288_v14 = vlaneseq  ;;  %s418_s21 = sshll.u32 %s646_s16, 3 }
  0x69   : > { %v257_v2 = vld [vmem:[%s221_s5] sm:$0xff]  ;;  %v258_v3 = vsub.f32 %v255_v0, %v256_v1  ;;  %v291_v19 = vstv %s418_s21  ;;  %p252_p8 = scmp.lt.s32.totalorder %s646_s16, 1  ;;  %vm301_vm6 = vcmask 0  }
  0x6a   : > { %v272_v4 = vsub.f32 %v255_v0, %v257_v2  ;;  %v289_v17 = vshrl.u32 %v288_v14, 7 }
  0x6b   : > { %v259_v5 = vadd.f32 1e-06, %v258_v3  ;;  %s837_s16 = smov (!%p252_p8, %s646_s16), 1 }
  0x6c   : > { %v273_v6 = vadd.f32 1e-06, %v272_v4  ;;  %v292_v25 = vadd.s32 %v291_v19, %v289_v17  ;;  %s254_s4 = scalar_lea.vmem %s820_s3, %s837_s16 }
  0x6d   : > { %v260_v7 = vmul.f32 %v259_v5, %v259_v5 }
  0x6e   : > { %v274_v8 = vmul.f32 %v273_v6, %v273_v6  ;;  %vm293_vm5 = vcmp.lt.s32.totalorder %v292_v25, 16 }
  0x6f   : > { %v262_v9 = vsel %vm261_vm0, %v260_v7, 0.0 }
  0x70   : > { %263 = vadd.xlane.f32.xlu0 %v262_v9  ;;  %v275_v10 = vsel %vm261_vm0, %v274_v8, 0.0 }
  0x74   : > { %276 = vadd.xlane.f32.xlu0 %v275_v10 }
  0xfd   : > { %v264_v11 = vpop.xlane.xlu0 %263 }
  0xfe   : > { %470 = vrsqrt.f32 %v264_v11  ;;  %vm267_vm1 = vcmp.eq.f32.partialorder %v264_v11, inf  ;;  %v270_v21 = vand.u32 2147483648, %v264_v11  ;;  %vm269_vm3 = vcmp.eq.f32.partialorder %v264_v11, 0.0 }
 0x101   : > { %v277_v12 = vpop.xlane.xlu0 %276 }
 0x102   : > { %472 = vrsqrt.f32 %v277_v12  ;;  %vm280_vm2 = vcmp.eq.f32.partialorder %v277_v12, inf  ;;  %v283_v22 = vand.u32 2147483648, %v277_v12  ;;  %vm282_vm4 = vcmp.eq.f32.partialorder %v277_v12, 0.0 }
 0x108   : > { %v471_v13 = vpop.eup %470 }
 0x109   : > { %v266_v15 = vmul.f32 %v471_v13, %v264_v11 }
 0x10b   : > { %v268_v18 = vsel %vm267_vm1, %v264_v11, %v266_v15 }
 0x10c   : > { %v473_v16 = vpop.eup %472  ;;  %v271_v24 = vsel %vm269_vm3, %v270_v21, %v268_v18 }
 0x10d   : > { %v279_v20 = vmul.f32 %v473_v16, %v277_v12 }
 0x10f   : > { %v281_v23 = vsel %vm280_vm2, %v277_v12, %v279_v20 }
 0x110   : > { %v284_v26 = vsel %vm282_vm4, %v283_v22, %v281_v23 }
 0x111   : > { %v285_v27 = vsub.f32 %v271_v24, %v284_v26 }
 0x113   : > { %v286_v28 = vadd.f32 1.0, %v285_v27 }
 0x115   : > { %v287_v29 = vmax.f32 %v286_v28, 0.0 }
 0x117   : > { %v294_v30 = vsel %vm293_vm5, %v287_v29, 0.0 }
 0x118   : > { %v295_v31 = vrot.slane %v294_v30, 4 }
 0x11a   : > { %v296_v32 = vadd.f32 %v295_v31, %v294_v30 }
 0x11c   : > { %v297_v33 = vrot.slane %v296_v32, 2 }
 0x11e   : > { %v298_v34 = vadd.f32 %v297_v33, %v296_v32 }
 0x120   : > { %v299_v35 = vrot.slane %v298_v34, 1 }
 0x122   : > { %v300_v36 = vadd.f32 %v299_v35, %v298_v34 }
 0x124   : > { %302 = vst.msk [vmem:[%s254_s4] sm:$0x1] %vm301_vm6, %v300_v36 }
 0x125 PF: > { %p16_p2 = scmp.ge.s32.totalorder %s649_s17, 4   ;;  %s832_s12 = smov %s594_s13 }
 0x126   : > { %s833_s13 = smov %s598_s14  ;;  %s834_s14 = smov %s659_s20 }
 0x127   : > { %s835_s15 = smov %s649_s17  ;;  %18 = sbr.rel (!%p16_p2) target bundleno = 5 (0x5), region = 96 }
 0x12e   :  { %320 = vsyncpa [#allocation3], 1 }
 0x12f   :  { %322 = vsyncpa [#allocation3 + $0x1], 1 }
 0x130   :  { %323 = vsyncpa [#allocation5], 1 }
 0x131   :  { %325 = vsyncpa [#allocation5 + $0x1], 1 }

</bundles_post_ra>
